<compile_context>
chip_gen: v7x
topology: tpu7x:2x2x1
jax: 0.10.0
libtpu: 0.0.40
codegen_flags: <defaults>
</compile_context>

<pallas_src>
import functools
import math

import jax
import jax.numpy as jnp
from jax.experimental import pallas as pl
from jax.experimental.pallas import tpu as pltpu


def _attention_kernel(x_ref, wqkv_ref, bqkv_ref, wproj_ref, bproj_ref, bias_ref,
                      y_ref, att_ref, *, n_head, mxu_dtype):
    """One grid step = one batch element.  Shapes (D = C // H):
         x_ref:(1,T,C)  wqkv_ref:(C,3C)  bqkv_ref:(1,3C)  wproj_ref:(C,C)
         bproj_ref:(1,C)  bias_ref:(1,T,T)  y_ref:(1,T,C)  att_ref:(1,H,T,T)
    """
    _, T, C = x_ref.shape
    H = n_head
    D = C // H

    x = x_ref[0]                                             # (T, C)

    # (1) Fused QKV projection: ONE wide MXU matmul (T, C) @ (C, 3C) with f32
    #     accumulation.  No per-head slicing, no replication of x or weights.
    #     The 1/sqrt(D) scale is already folded into the q columns.
    qkv = jnp.dot(x, wqkv_ref[...], preferred_element_type=jnp.float32)
    qkv = qkv + bqkv_ref[...]                                # (T, 3C) f32

    # (2) Head split: lane split (3C -> (3H, D)) then a lane-layout-aware
    #     transpose so (proj, head) becomes the leading/batch dim.
    qkv = pltpu.einshape("tgd->gtd", qkv.reshape(T, 3 * H, D))   # (3H, T, D)
    q = qkv[0 * H:1 * H].astype(mxu_dtype)                   # (H, T, D)
    k = qkv[1 * H:2 * H].astype(mxu_dtype)
    v = qkv[2 * H:3 * H].astype(mxu_dtype)

    # (3) Scores for all heads in one H-batched MXU contraction (K = D).
    s = jnp.einsum('htd,hud->htu', q, k,
                   preferred_element_type=jnp.float32)       # (H, T, T) f32

    # (4) Additive causal bias (precomputed resident input; no per-step iota).
    s = s + bias_ref[...]

    # (5) Softmax in f32.  Exact normalization: att is returned to the caller
    #     and must behave like probabilities (rows sum to 1).
    m = jnp.max(s, axis=-1, keepdims=True)
    e = jnp.exp(s - m)
    p = e / jnp.sum(e, axis=-1, keepdims=True)               # (H, T, T) f32

    att_ref[0] = p.astype(att_ref.dtype)

    # (6) Attention-weighted values, H-batched on the MXU.
    o = jnp.einsum('htu,hud->htd', p.astype(mxu_dtype), v,
                   preferred_element_type=jnp.float32)       # (H, T, D) f32

    # (7) Output projection with the head merge folded into the contraction:
    #     one (T, H*D) @ (H*D, C) matmul — the H-way reduction runs on the MXU.
    om = pltpu.einshape("htd->thd", o).reshape(T, C)         # (T, C), cols (h, d)
    y = jnp.dot(om.astype(mxu_dtype), wproj_ref[...],
                preferred_element_type=jnp.float32) + bproj_ref[...]
    y_ref[0] = y.astype(y_ref.dtype)


def _vmem_limit_bytes(T, C, H, mxu_dtype, att_dtype):
    """Rough per-step VMEM footprint (padded tiles, double-buffered blocks),
    clamped to [32 MiB, 64 MiB] so the limit is valid on v5e/v6e/v7x."""
    def padded_bytes(shape, dtype):
        s = list(shape)
        s[-1] = (s[-1] + 127) // 128 * 128
        if len(s) >= 2:
            s[-2] = (s[-2] + 7) // 8 * 8
        n = 1
        for d in s:
            n *= d
        return n * jnp.dtype(dtype).itemsize

    D = C // H
    blocks = (padded_bytes((T, C), mxu_dtype)            # x block
              + padded_bytes((C, 3 * C), mxu_dtype)      # wqkv
              + padded_bytes((1, 3 * C), jnp.float32)    # bqkv
              + padded_bytes((C, C), mxu_dtype)          # wproj
              + padded_bytes((1, C), jnp.float32)        # bproj
              + padded_bytes((T, T), jnp.float32)        # causal bias
              + padded_bytes((T, C), jnp.float32)        # y block
              + padded_bytes((H * T, T), att_dtype))     # att block
    intermediates = (padded_bytes((T, 3 * C), jnp.float32)
                     + 4 * padded_bytes((3 * H * T, D), jnp.float32)
                     + 4 * padded_bytes((H * T, T), jnp.float32))
    need = 2 * blocks + intermediates
    return max(32 << 20, min(64 << 20, int(need * 1.5)))


def attention_forward(x, params, n_head, *, mxu_dtype=jnp.bfloat16,
                      att_dtype=jnp.float32):
    """y, att = Attention(x) (eval mode; LoRA folded into the dense weights)."""
    B, T, C = x.shape
    H = n_head
    D = C // H
    scaling = params["scaling"]

    # Fold the LoRA low-rank update into the dense weights (eval mode: dropout
    # is identity).  PyTorch Linear stores (out, in); transpose to (in, out)
    # so every kernel matmul is a plain x @ W.
    wqkv = params["c_attn_w"] + scaling * (params["c_attn_B"] @ params["c_attn_A"])
    wproj = params["c_proj_w"] + scaling * (params["c_proj_B"] @ params["c_proj_A"])

    wqkv_r = wqkv.T                                      # (C, 3C), cols = (proj, head, d)
    bqkv_r = params["c_attn_b"].reshape(1, 3 * C)
    inv_sqrt_d = 1.0 / math.sqrt(D)                      # fold 1/sqrt(D) into q cols
    wqkv_r = wqkv_r.at[:, :C].multiply(inv_sqrt_d)
    bqkv_r = bqkv_r.at[:, :C].multiply(inv_sqrt_d)
    wproj_r = wproj.T                                    # (C, C), rows = (head, d)
    bproj_r = params["c_proj_b"].reshape(1, C)

    # Additive causal bias, precomputed once (constant index_map => DMA'd once).
    row = jax.lax.broadcasted_iota(jnp.int32, (T, T), 0)
    col = jax.lax.broadcasted_iota(jnp.int32, (T, T), 1)
    causal_bias = jnp.where(col <= row, 0.0, -1e30).astype(jnp.float32)[None]

    # MXU operands in mxu_dtype (bf16 default: 2x MXU rate and half the
    # weight/activation DMA on v6e/v7x); biases, softmax and all accumulations
    # stay float32 (v5e has no bf16 VPU/EUP).
    x_in = x.astype(mxu_dtype)
    wqkv_r = wqkv_r.astype(mxu_dtype)
    wproj_r = wproj_r.astype(mxu_dtype)
    bqkv_r = bqkv_r.astype(jnp.float32)
    bproj_r = bproj_r.astype(jnp.float32)

    kernel = functools.partial(_attention_kernel, n_head=H, mxu_dtype=mxu_dtype)
    y, att = pl.pallas_call(
        kernel,
        out_shape=(
            jax.ShapeDtypeStruct((B, T, C), x.dtype),
            jax.ShapeDtypeStruct((B, H, T, T), att_dtype),
        ),
        grid_spec=pltpu.PrefetchScalarGridSpec(
            num_scalar_prefetch=0,
            grid=(B,),
            in_specs=[
                pl.BlockSpec((1, T, C), lambda b: (b, 0, 0)),        # x
                pl.BlockSpec((C, 3 * C), lambda b: (0, 0)),          # wqkv
                pl.BlockSpec((1, 3 * C), lambda b: (0, 0)),          # bqkv
                pl.BlockSpec((C, C), lambda b: (0, 0)),              # wproj
                pl.BlockSpec((1, C), lambda b: (0, 0)),              # bproj
                pl.BlockSpec((1, T, T), lambda b: (0, 0, 0)),        # causal bias
            ],
            out_specs=(
                pl.BlockSpec((1, T, C), lambda b: (b, 0, 0)),        # y
                pl.BlockSpec((1, H, T, T), lambda b: (b, 0, 0, 0)),  # att
            ),
        ),
        compiler_params=pltpu.CompilerParams(
            dimension_semantics=("parallel",),
            vmem_limit_bytes=_vmem_limit_bytes(T, C, H, mxu_dtype, att_dtype)),
    )(x_in, wqkv_r, bqkv_r, wproj_r, bproj_r, causal_bias)
    return y, att


def reference_forward(x, params, n_head):
    """Pure-JAX reference mirroring the PyTorch module (eval mode)."""
    B, T, C = x.shape
    D = C // n_head
    scaling = params["scaling"]
    wqkv = params["c_attn_w"] + scaling * (params["c_attn_B"] @ params["c_attn_A"])
    wproj = params["c_proj_w"] + scaling * (params["c_proj_B"] @ params["c_proj_A"])
    qkv = x @ wqkv.T + params["c_attn_b"]
    q, k, v = jnp.split(qkv, 3, axis=2)
    q = q.reshape(B, T, n_head, D).transpose(0, 2, 1, 3)
    k = k.reshape(B, T, n_head, D).transpose(0, 2, 1, 3)
    v = v.reshape(B, T, n_head, D).transpose(0, 2, 1, 3)
    att = (q @ k.transpose(0, 1, 3, 2)) * (1.0 / math.sqrt(D))
    mask = jnp.tril(jnp.ones((T, T)))[None, None]
    att = jnp.where(mask == 0, -jnp.inf, att)
    att = jax.nn.softmax(att, axis=-1)
    out = (att @ v).transpose(0, 2, 1, 3).reshape(B, T, C)
    y = out @ wproj.T + params["c_proj_b"]
    return y, att


if __name__ == "__main__":
    # cfg: n_embd=32, n_head=4, block_size=8 -> B=2, T=8, C=32, head_dim=8, r=32
    B, T, C, H, R = 2, 8, 32, 4, 32
    key = jax.random.PRNGKey(0)
    ks = jax.random.split(key, 9)

    params = {
        "c_attn_w": 0.05 * jax.random.normal(ks[0], (3 * C, C), jnp.float32),
        "c_attn_b": 0.05 * jax.random.normal(ks[1], (3 * C,), jnp.float32),
        "c_attn_A": 0.05 * jax.random.normal(ks[2], (R, C), jnp.float32),
        "c_attn_B": 0.05 * jax.random.normal(ks[3], (3 * C, R), jnp.float32),
        "c_proj_w": 0.05 * jax.random.normal(ks[4], (C, C), jnp.float32),
        "c_proj_b": 0.05 * jax.random.normal(ks[5], (C,), jnp.float32),
        "c_proj_A": 0.05 * jax.random.normal(ks[6], (R, C), jnp.float32),
        "c_proj_B": 0.05 * jax.random.normal(ks[7], (C, R), jnp.float32),
        "scaling": 64.0 / 32.0,   # lora_alpha / r
    }
    x = jax.random.normal(ks[8], (B, T, C), jnp.float32)

    y_ref, att_ref = reference_forward(x, params, n_head=H)

    # 1) Default bf16 MXU operand path (v6e/v7x fast path), f32 accumulation.
    y, att = attention_forward(x, params, n_head=H)
    jax.block_until_ready((y, att))
    assert y.shape == (B, T, C) and att.shape == (B, H, T, T)
    assert jnp.allclose(y, y_ref, atol=5e-2, rtol=5e-2), "bf16: output mismatch"
    assert jnp.allclose(att, att_ref, atol=5e-2, rtol=5e-2), "bf16: attention mismatch"

    # 2) Full-f32 MXU operand path (tight numerics check).
    y32, att32 = attention_forward(x, params, n_head=H, mxu_dtype=jnp.float32)
    jax.block_until_ready((y32, att32))
    assert jnp.allclose(y32, y_ref, atol=5e-3, rtol=5e-3), "f32: output mismatch"
    assert jnp.allclose(att32, att_ref, atol=5e-3, rtol=5e-3), "f32: attention mismatch"

    print("KERNEL_OK")
</pallas_src>

<mosaic_0001>
module attributes {stable_mosaic.version = 11 : i64} {
  func.func @_attention_kernel(%arg0: i32, %arg1: memref<1x8x32xbf16, #tpu.memory_space<vmem>>, %arg2: memref<32x96xbf16, #tpu.memory_space<vmem>>, %arg3: memref<1x96xf32, #tpu.memory_space<vmem>>, %arg4: memref<32x32xbf16, #tpu.memory_space<vmem>>, %arg5: memref<1x32xf32, #tpu.memory_space<vmem>>, %arg6: memref<1x8x8xf32, #tpu.memory_space<vmem>>, %arg7: memref<1x8x32xf32, #tpu.memory_space<vmem>>, %arg8: memref<1x4x8x8xf32, #tpu.memory_space<vmem>>) attributes {dimension_semantics = [#tpu.dimension_semantics<parallel>], iteration_bounds = array<i64: 2>, scalar_prefetch = 0 : i64, scratch_operands = 0 : i64, tpu.core_type = #tpu.core_type<tc>, window_params = [{transform_indices = @transform_0, window_bounds = array<i64: 1, 8, 32>}, {pipeline_mode = #tpu.pipeline_mode<synchronous>, transform_indices = @transform_1, window_bounds = array<i64: 32, 96>}, {pipeline_mode = #tpu.pipeline_mode<synchronous>, transform_indices = @transform_2, window_bounds = array<i64: 1, 96>}, {pipeline_mode = #tpu.pipeline_mode<synchronous>, transform_indices = @transform_3, window_bounds = array<i64: 32, 32>}, {pipeline_mode = #tpu.pipeline_mode<synchronous>, transform_indices = @transform_4, window_bounds = array<i64: 1, 32>}, {pipeline_mode = #tpu.pipeline_mode<synchronous>, transform_indices = @transform_5, window_bounds = array<i64: 1, 8, 8>}, {transform_indices = @transform_6, window_bounds = array<i64: 1, 8, 32>}, {transform_indices = @transform_7, window_bounds = array<i64: 1, 4, 8, 8>}]} {
    %c0 = arith.constant 0 : index
    %c0_0 = arith.constant 0 : index
    %c0_1 = arith.constant 0 : index
    %0 = vector.load %arg1[%c0, %c0_0, %c0_1] : memref<1x8x32xbf16, #tpu.memory_space<vmem>>, vector<1x8x32xbf16>
    %1 = vector.shape_cast %0 : vector<1x8x32xbf16> to vector<8x32xbf16>
    %c0_2 = arith.constant 0 : index
    %c0_3 = arith.constant 0 : index
    %2 = vector.load %arg2[%c0_2, %c0_3] : memref<32x96xbf16, #tpu.memory_space<vmem>>, vector<32x96xbf16>
    %cst = arith.constant dense<0.000000e+00> : vector<8x96xf32>
    %3 = tpu.matmul %1, %2, %cst {dimension_numbers = #tpu.dot_dimension_numbers<[1], [0], [0], [1], [0, 0, 1, 1], [], []>} : vector<8x32xbf16>, vector<32x96xbf16>, vector<8x96xf32> -> vector<8x96xf32>
    %c0_4 = arith.constant 0 : index
    %c0_5 = arith.constant 0 : index
    %4 = vector.load %arg3[%c0_4, %c0_5] : memref<1x96xf32, #tpu.memory_space<vmem>>, vector<1x96xf32>
    %5 = vector.broadcast %4 : vector<1x96xf32> to vector<8x96xf32>
    %6 = arith.addf %3, %5 : vector<8x96xf32>
    %7 = vector.shape_cast %6 : vector<8x96xf32> to vector<8x12x8xf32>
    %8 = tpu.transpose %7, [1, 0, 2] : vector<8x12x8xf32> -> vector<12x8x8xf32>
    %9 = vector.extract_strided_slice %8 {offsets = [0, 0, 0], sizes = [4, 8, 8], strides = [1, 1, 1]} : vector<12x8x8xf32> to vector<4x8x8xf32>
    %10 = arith.truncf %9 : vector<4x8x8xf32> to vector<4x8x8xbf16>
    %11 = vector.extract_strided_slice %8 {offsets = [4, 0, 0], sizes = [4, 8, 8], strides = [1, 1, 1]} : vector<12x8x8xf32> to vector<4x8x8xf32>
    %12 = arith.truncf %11 : vector<4x8x8xf32> to vector<4x8x8xbf16>
    %13 = vector.extract_strided_slice %8 {offsets = [8, 0, 0], sizes = [4, 8, 8], strides = [1, 1, 1]} : vector<12x8x8xf32> to vector<4x8x8xf32>
    %14 = arith.truncf %13 : vector<4x8x8xf32> to vector<4x8x8xbf16>
    "tpu.trace_start"() <{level = 10 : i32, message = "htd,hud->htu"}> : () -> ()
    %cst_6 = arith.constant dense<0.000000e+00> : vector<4x8x8xf32>
    %15 = tpu.matmul %10, %12, %cst_6 {dimension_numbers = #tpu.dot_dimension_numbers<[2], [2], [1], [1], [0, 0, 0, 1, 1, 1], [0], [0]>} : vector<4x8x8xbf16>, vector<4x8x8xbf16>, vector<4x8x8xf32> -> vector<4x8x8xf32>
    "tpu.trace_stop"() : () -> ()
    %c0_7 = arith.constant 0 : index
    %c0_8 = arith.constant 0 : index
    %c0_9 = arith.constant 0 : index
    %16 = vector.load %arg6[%c0_7, %c0_8, %c0_9] : memref<1x8x8xf32, #tpu.memory_space<vmem>>, vector<1x8x8xf32>
    %17 = vector.broadcast %16 : vector<1x8x8xf32> to vector<4x8x8xf32>
    %18 = arith.addf %15, %17 : vector<4x8x8xf32>
    %cst_10 = arith.constant dense<0xFF800000> : vector<4x8xf32>
    %19 = vector.multi_reduction <maximumf>, %18, %cst_10 [2] : vector<4x8x8xf32> to vector<4x8xf32>
    %20 = vector.shape_cast %19 : vector<4x8xf32> to vector<4x8x1xf32>
    %21 = vector.broadcast %20 : vector<4x8x1xf32> to vector<4x8x8xf32>
    %22 = arith.subf %18, %21 : vector<4x8x8xf32>
    %23 = math.exp %22 : vector<4x8x8xf32>
    %cst_11 = arith.constant dense<0.000000e+00> : vector<4x8xf32>
    %24 = vector.multi_reduction <add>, %23, %cst_11 [2] : vector<4x8x8xf32> to vector<4x8xf32>
    %25 = vector.shape_cast %24 : vector<4x8xf32> to vector<4x8x1xf32>
    %26 = vector.broadcast %25 : vector<4x8x1xf32> to vector<4x8x8xf32>
    %27 = arith.divf %23, %26 : vector<4x8x8xf32>
    %c0_12 = arith.constant 0 : index
    %c0_13 = arith.constant 0 : index
    %c0_14 = arith.constant 0 : index
    %c0_15 = arith.constant 0 : index
    %28 = vector.load %arg8[%c0_12, %c0_13, %c0_14, %c0_15] : memref<1x4x8x8xf32, #tpu.memory_space<vmem>>, vector<1x4x8x8xf32>
    %29 = vector.shape_cast %28 : vector<1x4x8x8xf32> to vector<4x8x8xf32>
    %30 = vector.shape_cast %27 : vector<4x8x8xf32> to vector<1x4x8x8xf32>
    tpu.vector_store %arg8[%c0_12, %c0_13, %c0_14, %c0_15], %30 {strides = array<i32>} : memref<1x4x8x8xf32, #tpu.memory_space<vmem>>, vector<1x4x8x8xf32>,
    %31 = arith.truncf %27 : vector<4x8x8xf32> to vector<4x8x8xbf16>
    "tpu.trace_start"() <{level = 10 : i32, message = "htu,hud->htd"}> : () -> ()
    %cst_16 = arith.constant dense<0.000000e+00> : vector<4x8x8xf32>
    %32 = tpu.matmul %31, %14, %cst_16 {dimension_numbers = #tpu.dot_dimension_numbers<[2], [1], [1], [2], [0, 0, 0, 1, 1, 2], [0], [0]>} : vector<4x8x8xbf16>, vector<4x8x8xbf16>, vector<4x8x8xf32> -> vector<4x8x8xf32>
    "tpu.trace_stop"() : () -> ()
    %33 = tpu.transpose %32, [1, 0, 2] : vector<4x8x8xf32> -> vector<8x4x8xf32>
    %34 = vector.shape_cast %33 : vector<8x4x8xf32> to vector<8x32xf32>
    %35 = arith.truncf %34 : vector<8x32xf32> to vector<8x32xbf16>
    %c0_17 = arith.constant 0 : index
    %c0_18 = arith.constant 0 : index
    %36 = vector.load %arg4[%c0_17, %c0_18] : memref<32x32xbf16, #tpu.memory_space<vmem>>, vector<32x32xbf16>
    %cst_19 = arith.constant dense<0.000000e+00> : vector<8x32xf32>
    %37 = tpu.matmul %35, %36, %cst_19 {dimension_numbers = #tpu.dot_dimension_numbers<[1], [0], [0], [1], [0, 0, 1, 1], [], []>} : vector<8x32xbf16>, vector<32x32xbf16>, vector<8x32xf32> -> vector<8x32xf32>
    %c0_20 = arith.constant 0 : index
    %c0_21 = arith.constant 0 : index
    %38 = vector.load %arg5[%c0_20, %c0_21] : memref<1x32xf32, #tpu.memory_space<vmem>>, vector<1x32xf32>
    %39 = vector.broadcast %38 : vector<1x32xf32> to vector<8x32xf32>
    %40 = arith.addf %37, %39 : vector<8x32xf32>
    %c0_22 = arith.constant 0 : index
    %c0_23 = arith.constant 0 : index
    %c0_24 = arith.constant 0 : index
    %41 = vector.load %arg7[%c0_22, %c0_23, %c0_24] : memref<1x8x32xf32, #tpu.memory_space<vmem>>, vector<1x8x32xf32>
    %42 = vector.shape_cast %41 : vector<1x8x32xf32> to vector<8x32xf32>
    %43 = vector.shape_cast %40 : vector<8x32xf32> to vector<1x8x32xf32>
    tpu.vector_store %arg7[%c0_22, %c0_23, %c0_24], %43 {strides = array<i32>} : memref<1x8x32xf32, #tpu.memory_space<vmem>>, vector<1x8x32xf32>,
    return
  }
  func.func @transform_0(%arg0: i32) -> (i32, i32, i32) {
    %c0_i32 = arith.constant 0 : i32
    %c0_i32_0 = arith.constant 0 : i32
    %c0_i32_1 = arith.constant 0 : i32
    return %arg0, %c0_i32, %c0_i32_0 : i32, i32, i32
  }
  func.func @transform_1(%arg0: i32) -> (i32, i32) {
    %c0_i32 = arith.constant 0 : i32
    %c0_i32_0 = arith.constant 0 : i32
    %c0_i32_1 = arith.constant 0 : i32
    return %c0_i32, %c0_i32_0 : i32, i32
  }
  func.func @transform_2(%arg0: i32) -> (i32, i32) {
    %c0_i32 = arith.constant 0 : i32
    %c0_i32_0 = arith.constant 0 : i32
    %c0_i32_1 = arith.constant 0 : i32
    return %c0_i32, %c0_i32_0 : i32, i32
  }
  func.func @transform_3(%arg0: i32) -> (i32, i32) {
    %c0_i32 = arith.constant 0 : i32
    %c0_i32_0 = arith.constant 0 : i32
    %c0_i32_1 = arith.constant 0 : i32
    return %c0_i32, %c0_i32_0 : i32, i32
  }
  func.func @transform_4(%arg0: i32) -> (i32, i32) {
    %c0_i32 = arith.constant 0 : i32
    %c0_i32_0 = arith.constant 0 : i32
    %c0_i32_1 = arith.constant 0 : i32
    return %c0_i32, %c0_i32_0 : i32, i32
  }
  func.func @transform_5(%arg0: i32) -> (i32, i32, i32) {
    %c0_i32 = arith.constant 0 : i32
    %c0_i32_0 = arith.constant 0 : i32
    %c0_i32_1 = arith.constant 0 : i32
    %c0_i32_2 = arith.constant 0 : i32
    return %c0_i32, %c0_i32_0, %c0_i32_1 : i32, i32, i32
  }
  func.func @transform_6(%arg0: i32) -> (i32, i32, i32) {
    %c0_i32 = arith.constant 0 : i32
    %c0_i32_0 = arith.constant 0 : i32
    %c0_i32_1 = arith.constant 0 : i32
    return %arg0, %c0_i32, %c0_i32_0 : i32, i32, i32
  }
  func.func @transform_7(%arg0: i32) -> (i32, i32, i32, i32) {
    %c0_i32 = arith.constant 0 : i32
    %c0_i32_0 = arith.constant 0 : i32
    %c0_i32_1 = arith.constant 0 : i32
    %c0_i32_2 = arith.constant 0 : i32
    return %arg0, %c0_i32, %c0_i32_0, %c0_i32_1 : i32, i32, i32, i32
  }
}

</mosaic_0001>

<bundles_post_ra>
// kernel: tpu_custom_call.1
= control target key start
LH: loop header
LB: loop body
LE: loop exit
PB: predicated region body
PF: predicated region fallthrough
CT: control target
= control target key end

     0   :  { %s2597_s0 = inlined_call_operand.hbm [shape: bf16[2,8,32], index: 0, kind: input, shape index: {}]   ;;  %s2598_s1 = inlined_call_operand.hbm [shape: bf16[32,96], index: 1, kind: input, shape index: {}]   ;;  %s2599_s2 = inlined_call_operand.vmem [shape: f32[1,96], index: 2, kind: input, shape index: {}]   ;;  %s2600_s3 = inlined_call_operand.hbm [shape: bf16[32,32], index: 3, kind: input, shape index: {}]   ;;  %s2601_s4 = inlined_call_operand.vmem [shape: f32[1,32], index: 4, kind: input, shape index: {}]   ;;  %s2602_s5 = inlined_call_operand.vmem [shape: f32[1,8,8], index: 5, kind: input, shape index: {}]   ;;  %s2603_s6 = inlined_call_operand.hbm [shape: f32[2,8,32], index: 6, kind: output, shape index: {0}]   ;;  %s2604_s7 = inlined_call_operand.hbm [shape: f32[2,4,8,8], index: 7, kind: output, shape index: {1}]  }
   0x1   :  { %2608 = sst [smem:[#allocation15_spill]] %s2597_s0 }
   0x2   :  { %13 = vsyncpa [#allocation3], 0 }
   0x3   :  { %15 = vsyncpa [#allocation3 + $0x1], 0 }
   0x4   :  { %16 = vsyncpa [#allocation6], 0 }
   0x5   :  { %17 = vsyncpa [#allocation4], 0 }
   0x6   :  { %19 = vsyncpa [#allocation4 + $0x1], 0 }
   0x7   :  { %20 = vsyncpa [#allocation10], 0 }
   0x8   :  { %22 = vsyncpa [#allocation10 + $0x1], 0  ;;  %s2161_s24 = smov 0   ;;  %s2163_s25 = smov 0  }
   0x9   :  { %s2165_s26 = smov 0   ;;  %s2167_s27 = smov 0  }
   0xa LB: > { %s2182_s28 = sadd.s32 4294967295, %s2093_s27   ;;  %s1657_s29 = sadd.s32 4294967294, %s2093_s27   ;;  %s2093_s27 = sphi %s2167_s27, %s2626_s27   ;;  %s2089_s26 = sphi %s2165_s26, %s2625_s26   ;;  %s2085_s25 = sphi %s2163_s25, %s2624_s25   ;;  %s2081_s24 = sphi %s2161_s24, %s2623_s24  }
   0xb   : > { %p48_p0 = scmp.ne.s32.totalorder %s2085_s25, %s2081_s24  ;;  %p2605_p1 = scmp.eq.s32.totalorder %s2182_s28, 0 }
   0xc   : > { %p183_p3 = scmp.eq.s32.totalorder %s1657_s29, 1  ;;  %p1658_p5 = scmp.ge.s32.totalorder %s2093_s27, 1 }
   0xd   : > { %p2191_p4 = por %p2605_p1, %p48_p0  ;;  %p216_p7 = scmp.lt.s32.totalorder %s2093_s27, 3 }
   0xe   : > { %p2196_p6 = por %p183_p3, %p48_p0  ;;  %s2095_s10 = smov [#allocation5]  }
   0xf   : > { %s2609_s30 = scalar_select %p2191_p4, 1, 0 }
  0x10   : > { %s2610_s8 = scalar_select %p2196_p6, 1, 0 }
  0x11   : > { %p2201_p8 = pnand %p1658_p5, %p216_p7  ;;  %s228_s11 = sshll.u32 %s2095_s10, 4  ;;  %s2205_s11 = int_to_ptr.vmem [resolvable:$true] %s228_s11 }
  0x12   : > { %s2096_s13 = smov [#allocation7]   ;;  %s1905_s17 = scalar_lea.hbm %s2598_s1, 256 }
  0x13   : > { %p1806_p9 = pneg %p2201_p8  ;;  %s244_s14 = sshll.u32 %s2096_s13, 4  ;;  %s2216_s14 = int_to_ptr.vmem [resolvable:$true] %s244_s14 }
  0x14   : > { %p1906_p12 = scmp.ne.s32.totalorder %s2598_s1, %s1905_s17  ;;  %p1912_p5 = scmp.lt.u32.totalorder %s1905_s17, %s2598_s1 }
  0x15   : > { %p2212_p11 = pnand %p1806_p9, %p2605_p1 }
  0x17   : > { %p1907_p13 = pneg %p2212_p11 }
  0x19   : > { %p1908_p0 = pnand %p1907_p13, %p1906_p12 }
  0x1b   : > { %p1909_p3 = pneg %p1908_p0 }
  0x1d   : > { %p1914_p7 = pnand %p1912_p5, %p1909_p3 }
  0x1f   : > { %1917 = shalt.err (!%p1914_p7)
}
  0x20   : > { %s1918_s22 = scalar_lea.vmem %s2205_s11, 256  ;;  %p1926_p2 = scmp.lt.s32.totalorder %s2205_s11, %s2205_s11 }
  0x21   : > { %p1919_p9 = scmp.ne.s32.totalorder %s2205_s11, %s1918_s22  ;;  %p1927_p12 = scmp.lt.s32.totalorder %s1918_s22, %s1918_s22 }
  0x23   : > { %p1921_p10 = pnand %p1919_p9, %p1907_p13  ;;  %p1928_p0 = por %p1927_p12, %p1926_p2 }
  0x25   : > { %p1922_p1 = pneg %p1921_p10 }
  0x27   : > { %p1929_p6 = pnand %p1928_p0, %p1922_p1 }
  0x29   : > { %1932 = shalt.err (!%p1929_p6)
}
  0x2a   : > { %s2097_s23 = smov 64   ;;  %s2098_s29 = smov 4  }
  0x2b   : > { %1809 = dma.hbm_to_vmem [thread:$0]  (!%p2212_p11), %s2598_s1, 256, %s2205_s11, [#allocation6], %s2097_s23, %s2097_s23, %s2098_s29  }
  0x2c   : > { %s1933_s17 = scalar_lea.hbm %s2600_s3, 256 }
  0x2d   : > { %p1934_p2 = scmp.ne.s32.totalorder %s2600_s3, %s1933_s17  ;;  %p1940_p10 = scmp.lt.u32.totalorder %s1933_s17, %s2600_s3 }
  0x2f   : > { %p1936_p1 = pnand %p1934_p2, %p1907_p13 }
  0x31   : > { %p1937_p6 = pneg %p1936_p1 }
  0x33   : > { %p1942_p3 = pnand %p1940_p10, %p1937_p6 }
  0x35   : > { %1945 = shalt.err (!%p1942_p3)
}
  0x36   : > { %s1946_s11 = scalar_lea.vmem %s2216_s14, 256  ;;  %p1954_p12 = scmp.lt.s32.totalorder %s2216_s14, %s2216_s14 }
  0x37   : > { %p1947_p5 = scmp.ne.s32.totalorder %s2216_s14, %s1946_s11  ;;  %p1955_p0 = scmp.lt.s32.totalorder %s1946_s11, %s1946_s11 }
  0x39   : > { %p1949_p7 = pnand %p1947_p5, %p1907_p13  ;;  %p1956_p2 = por %p1955_p0, %p1954_p12 }
  0x3b   : > { %p1950_p9 = pneg %p1949_p7 }
  0x3d   : > { %p1957_p1 = pnand %p1956_p2, %p1950_p9 }
  0x3f   : > { %1960 = shalt.err (!%p1957_p1)
}
  0x40   : > { %1812 = dma.hbm_to_vmem [thread:$0]  (!%p2212_p11), %s2600_s3, 256, %s2216_s14, [#allocation6], %s2097_s23, %s2097_s23, %s2098_s29  }
  0x41   : > { %s2271_s13 = sadd.s32 1, %s2093_s27   ;;  %s35_s12 = sadd.s32 1, %s2089_s26 }
  0x42   : > { %s32_s15 = ssub.s32 %s2093_s27, %s2271_s13  ;;  %p42_p13 = scmp.ne.s32.totalorder %s2089_s26, %s2085_s25 }
  0x43   : > { %p33_p6 = scmp.eq.s32.totalorder %s32_s15, 0  ;;  %p43_p10 = scmp.eq.s32.totalorder %s2093_s27, 0 }
  0x44   : > { %p2613_p3 = scmp.eq.s32.totalorder %s2182_s28, 1  ;;  %p1826_p7 = scmp.lt.s32.totalorder %s2093_s27, 2 }
  0x45   : > { %s2287_s17 = scalar_select %p33_p6, %s2089_s26, %s35_s12  }
  0x46   : > { %p2281_p5 = por %p2613_p3, %p42_p13  ;;  %p44_p9 = por %p43_p10, %p42_p13 }
  0x47   : > { %s264_s18 = sand.u32 1, %s2089_s26   ;;  %s1663_s14 = sshll.u32 %s2093_s27, 6 }
  0x48   : > { %s2614_s16 = scalar_select %p2281_p5, 1, 0 }
  0x49   : > { %s1662_s19 = sshll.u32 %s264_s18, 2  ;;  %s2615_s0 = sld [smem:[#allocation15_spill]] }
  0x4a   : > { %s268_s21 = scalar_lea.vmem [#allocation2], %s1662_s19  ;;  %p2298_p11 = pnand %p1826_p7, %p44_p9 }
  0x4b   : > { %s275_s11 = sshll.u32 %s268_s21, 4  ;;  %s265_s10 = scalar_lea.sflag [#allocation3], %s264_s18  ;;  %s2296_s11 = int_to_ptr.vmem [resolvable:$true] %s275_s11 }
  0x4c   : > { %p1963_p0 = pneg %p2298_p11 }
  0x4f   : > { %s2294_s20 = scalar_lea.hbm %s2615_s0, %s1663_s14  ;;  %s1966_s14 = scalar_lea.hbm %s2615_s0, 128 }
  0x50   : > { %s1961_s12 = scalar_lea.hbm %s2294_s20, 64  ;;  %p1967_p13 = scmp.lt.u32.totalorder %s2294_s20, %s2615_s0 }
  0x51   : > { %p1962_p12 = scmp.ne.s32.totalorder %s2294_s20, %s1961_s12  ;;  %p1968_p6 = scmp.lt.u32.totalorder %s1966_s14, %s1961_s12 }
  0x52   : > { %p1970_p3 = scmp.lt.u32.totalorder %s1961_s12, %s2294_s20 }
  0x53   : > { %p1964_p2 = pnand %p1963_p0, %p1962_p12  ;;  %p1969_p10 = por %p1968_p6, %p1967_p13 }
  0x55   : > { %p1965_p1 = pneg %p1964_p2  ;;  %p1971_p7 = por %p1970_p3, %p1969_p10 }
  0x57   : > { %p1972_p9 = pnand %p1971_p7, %p1965_p1 }
  0x59   : > { %1975 = shalt.err (!%p1972_p9)
}
  0x5a   : > { %s1976_s18 = scalar_lea.vmem %s2296_s11, 64  ;;  %s2099_s21 = smov [#allocation2]  }
  0x5b   : > { %p1977_p12 = scmp.ne.s32.totalorder %s2296_s11, %s1976_s18  ;;  %s1981_s15 = sshll.u32 %s2099_s21, 4  ;;  %s1982_s15 = int_to_ptr.vmem [resolvable:$false] %s1981_s15 }
  0x5c   : > { %s1983_s19 = scalar_lea.vmem %s1982_s15, 128  ;;  %p1984_p4 = scmp.lt.s32.totalorder %s2296_s11, %s1982_s15 }
  0x5d   : > { %p1979_p2 = pnand %p1977_p12, %p1963_p0  ;;  %p1985_p13 = scmp.lt.s32.totalorder %s1983_s19, %s1976_s18 }
  0x5f   : > { %p1980_p5 = pneg %p1979_p2  ;;  %p1986_p6 = por %p1985_p13, %p1984_p4 }
  0x61   : > { %p1987_p10 = pnand %p1986_p6, %p1980_p5 }
  0x63   : > { %1990 = shalt.err (!%p1987_p10)
}
  0x64   : > { %1816 = dma.hbm_to_vmem [thread:$0]  (!%p2298_p11), %s2294_s20, 64, %s2296_s11, %s265_s10  }
  0x65   : > { %284 = sbr.rel (%p2201_p8) target bundleno = 1648 (0x670), region = 44  ;;  %s2330_s12 = sand.u32 (!%p2201_p8), 1, %s2085_s25  }
  0x66   : > { %s1665_s14 = sshll.u32 (!%p2201_p8), %s2330_s12, 2  ;;  %s287_s23 = scalar_lea.sflag (!%p2201_p8), [#allocation3], %s2330_s12 }
  0x67   : > { %s290_s29 = scalar_lea.vmem (!%p2201_p8), [#allocation2], %s1665_s14  ;;  %p2617_p4 = scmp.ne.s32.totalorder (!%p2201_p8), %s2609_s30, 0 }
  0x6c   : > { %2064 = dma.done.wait (%p2617_p4), %s287_s23, 64  }
  0x6d   : > { %2066 = vsyncadd (%p2617_p4), %s287_s23, 4294967232  ;;  %p2618_p5 = scmp.eq.s32.totalorder %s2182_s28, 0 }
  0x6f   : > { %2068 = dma.done.wait (%p2618_p5), [#allocation6], 512   ;;  %p2619_p11 = pmov %p2618_p5 }
  0x70   : > { %v2100_v0 = vmov 0.0   ;;  %vm2101_vm0 = vmmov 0   ;;  %v1885_v1 = vld [vmem:[#allocation5] sm:$0xff]   ;;  %v1886_v2 = vld [vmem:[#allocation5 + $0x8] sm:$0xff]   ;;  %v335_v3 = vld [vmem:[%s290_s29] sm:$0xf]  ;;  %v442_v12 = vlaneseq }
  0x71   : > { %2070 = vsyncadd (%p2619_p11), [#allocation6], 4294966784  ;;  %1728 = vmatprep.subr.bf16.mxu0 %v2100_v0  ;;  %1732 = vmatprep.mubr.msk.bf16.mxu0 %vm2101_vm0, %v2100_v0  ;;  %vm359_vm1 = vcmask 261120   ;;  %v1670_v4 = vld [vmem:[%s2599_s2] ss:$0 sm:$0xff]  ;;  %s2102_s20 = smov 80  }
  0x72   : > { %1736 = vmatprep.subr.bf16.mxu1 %v2100_v0  ;;  %1738 = vmatprep.mubr.msk.bf16.mxu1 %vm2101_vm0, %v2100_v0  ;;  %s2103_s11 = smov 96   ;;  %s2104_s22 = smov 72   ;;  %v2109_v10 = vmov 1983009808   ;;  %v2110_v13 = vmov 1934713408  }
  0x73   : > { %1729 = vmatpush3.bf16.msra.mxu0 %v1885_v1  ;;  %s2105_s10 = smov 88   ;;  %s2106_s18 = smov 112   ;;  %v440_v11 = vunpack.c.l.s4 %v2109_v10  ;;  %v504_v14 = vunpack.c.l.s4 %v2110_v13  ;;  %v443_v16 = vshrl.u32 %v442_v12, 7  ;;  %vm858_vm2 = vcmask 64512  }
  0x74   : > { %1730 = vmatprep.subr.bf16.mxu0 %v2100_v0  ;;  %s2107_s21 = smov 120   ;;  %s2108_s15 = smov 104   ;;  %vm1098_vm3 = vcmask 1043456   ;;  %vm1429_vm4 = vcmask 130048   ;;  %vm1431_vm5 = vcmask 195584  }
  0x75   : > { %v441_v15 = vunpack.c.0.s8 %v440_v11  ;;  %v505_v19 = vunpack.c.0.s8 %v504_v14  ;;  %s2111_s23 = smov 56   ;;  %s2112_s29 = smov 64  }
  0x76   : > { %s2113_s30 = smov 48   ;;  %s2114_s9 = smov 40  }
  0x77   : > { %1731 = vmatpush3.bf16.msra.mxu0 %v1886_v2  ;;  %v2365_v20 = vsub.s32 %v441_v15, %v443_v16  ;;  %v2367_v27 = vsub.s32 %v505_v19, %v443_v16  ;;  %p2620_p0 = scmp.ne.s32.totalorder %s2614_s16, 0 }
  0x78   : > { %1742 = vmatprep.subr.bf16.mxu0 %v2100_v0 }
  0x7a   : > { %1733 = vmatmul.mubr.msk.bf16.vlgmr.msra.gmra.mrb[0].mxu0 %vm359_vm1, %v335_v3 }
  0x7b   : > { %1744 = vmatprep.mubr.msk.bf16.mxu0 %vm2101_vm0, %v2100_v0 }
 0x14d   : > { %v397_v5 = vpop.f32.mrb[0].mxu0 }
 0x14e   : > { %v2356_v6 = vadd.f32 %v1670_v4, %v397_v5  ;;  %v1734_v7 = vpop.f32.mrb[1].mxu0 }
 0x14f   : > { %v400_v8 = vpop.f32.mrb[2].mxu0 }
 0x150   : > { %419 = vrot.lane.b32.xlu1 %v2356_v6, %s2102_s20  ;;  %413 = vrot.lane.b32.xlu0 %v2356_v6, %s2103_s11  ;;  %v1735_v9 = vpop.f32.mrb[3].mxu0  ;;  %s1669_s20 = sshll.u32 %s2330_s12, 5 }
 0x151   : > { %s2453_s11 = scalar_lea.vmem [#allocation9], %s1669_s20 }
 0x154   : > { %422 = vrot.lane.b32.xlu1 %v2356_v6, %s2104_s22  ;;  %416 = vrot.lane.b32.xlu0 %v2356_v6, %s2105_s10  ;;  %s2115_s22 = smov 16   ;;  %s2116_s10 = smov 8  }
 0x158   : > { %407 = vrot.lane.b32.xlu1 %v2356_v6, %s2106_s18  ;;  %404 = vrot.lane.b32.xlu0 %v2356_v6, %s2107_s21  ;;  %s2117_s18 = smov 24   ;;  %s1705_s21 = sshll.u32 %s2182_s28, 9 }
 0x15c   : > { %410 = vrot.lane.b32.xlu0 %v2356_v6, %s2108_s15  ;;  %s1533_s15 = sshll.u32 %s2453_s11, 4  ;;  %s2517_s15 = int_to_ptr.vmem [resolvable:$true] %s1533_s15 }
 0x1c2   : > { %v420_v17 = vpop.permute.xlu1 %419  ;;  %v414_v18 = vpop.permute.xlu0 %413 }
 0x1c3   : > { %v469_v21 = vcombine.low %v414_v18, %v420_v17  ;;  %v470_v22 = vcombine.high %v414_v18, %v420_v17 }
 0x1c5   : > { %v477_v28 = vrot.slane %v469_v21, %v2365_v20  ;;  %v484_v29 = vrot.slane %v470_v22, %v2365_v20 }
 0x1c6   : > { %v423_v23 = vpop.permute.xlu1 %422  ;;  %v417_v24 = vpop.permute.xlu0 %416 }
 0x1c7   : > { %v485_v25 = vcombine.low %v417_v24, %v423_v23  ;;  %v486_v26 = vcombine.high %v417_v24, %v423_v23 }
 0x1c9   : > { %v493_v30 = vrot.slane %v485_v25, %v2365_v20  ;;  %v500_v31 = vrot.slane %v486_v26, %v2365_v20 }
 0x1ca   : > { %v405_v32 = vpop.permute.xlu0 %404  ;;  %v408_v37 = vpop.permute.xlu1 %407 }
 0x1cb   : > { %v533_v33 = vcombine.low %v477_v28, %v493_v30  ;;  %v534_v34 = vcombine.high %v477_v28, %v493_v30  ;;  %v549_v35 = vcombine.low %v484_v29, %v500_v31  ;;  %v550_v36 = vcombine.high %v484_v29, %v500_v31 }
 0x1cc   : > { %v437_v42 = vcombine.low %v2356_v6, %v408_v37  ;;  %v438_v43 = vcombine.high %v2356_v6, %v408_v37 }
 0x1cd   : > { %v541_v38 = vrot.slane %v533_v33, %v2367_v27  ;;  %v548_v39 = vrot.slane %v534_v34, %v2367_v27  ;;  %v557_v40 = vrot.slane %v549_v35, %v2367_v27  ;;  %v564_v41 = vrot.slane %v550_v36, %v2367_v27 }
 0x1ce   : > { %v411_v44 = vpop.permute.xlu0 %410  ;;  %v445_v55 = vrot.slane %v437_v42, %v2365_v20  ;;  %v452_v56 = vrot.slane %v438_v43, %v2365_v20 }
 0x1cf   : > { %v1675_v45 = vcombine.low %v541_v38, %v548_v39  ;;  %v1677_v46 = vcombine.high %v541_v38, %v548_v39  ;;  %v1679_v47 = vcombine.low %v557_v40, %v564_v41  ;;  %v1681_v48 = vcombine.high %v557_v40, %v564_v41 }
 0x1d0   : > { %v453_v49 = vcombine.low %v405_v32, %v411_v44  ;;  %v454_v50 = vcombine.high %v405_v32, %v411_v44 }
 0x1d1   : > { %v656_v51 = vrot.slane %v1675_v45, %v2365_v20  ;;  %v672_v52 = vrot.slane %v1677_v46, %v2365_v20  ;;  %v688_v53 = vrot.slane %v1679_v47, %v2365_v20  ;;  %v704_v54 = vrot.slane %v1681_v48, %v2365_v20 }
 0x1d2   : > { %v461_v57 = vrot.slane %v453_v49, %v2365_v20  ;;  %v468_v58 = vrot.slane %v454_v50, %v2365_v20 }
 0x1d3   : > { %v721_v59 = vcombine.low %v656_v51, %v672_v52  ;;  %v753_v60 = vcombine.low %v688_v53, %v704_v54  ;;  %v722_v4 = vcombine.high %v656_v51, %v672_v52  ;;  %v754_v5 = vcombine.high %v688_v53, %v704_v54  ;;  %v857_v51 = vld [vmem:[%s2602_s5] sm:$0xff] }
 0x1d4   : > { %v501_v61 = vcombine.low %v445_v55, %v461_v57  ;;  %v502_v62 = vcombine.high %v445_v55, %v461_v57  ;;  %v517_v63 = vcombine.low %v452_v56, %v468_v58  ;;  %v518_v1 = vcombine.high %v452_v56, %v468_v58 }
 0x1d5   : > { %v729_v2 = vrot.slane %v721_v59, %v2367_v27  ;;  %v761_v3 = vrot.slane %v753_v60, %v2367_v27  ;;  %v736_v19 = vrot.slane %v722_v4, %v2367_v27  ;;  %v768_v21 = vrot.slane %v754_v5, %v2367_v27 }
 0x1d6   : > { %v509_v7 = vrot.slane %v501_v61, %v2367_v27  ;;  %v516_v8 = vrot.slane %v502_v62, %v2367_v27  ;;  %v525_v9 = vrot.slane %v517_v63, %v2367_v27  ;;  %v532_v10 = vrot.slane %v518_v1, %v2367_v27 }
 0x1d7   : > { %v773_v11 = vcombine.low %v729_v2, %v761_v3  ;;  %v774_v12 = vcombine.high %v729_v2, %v761_v3  ;;  %v775_v31 = vcombine.low %v736_v19, %v768_v21  ;;  %v776_v32 = vcombine.high %v736_v19, %v768_v21 }
 0x1d8   : > { %v1674_v13 = vcombine.low %v509_v7, %v516_v8  ;;  %v1676_v14 = vcombine.high %v509_v7, %v516_v8  ;;  %v1678_v15 = vcombine.low %v525_v9, %v532_v10  ;;  %v1680_v16 = vcombine.high %v525_v9, %v532_v10 }
 0x1d9   : > { %v849_v17 = vpack.c.bf16 %v773_v11, %v773_v11  ;;  %v850_v18 = vpack.c.bf16 %v774_v12, %v774_v12  ;;  %v851_v39 = vpack.c.bf16 %v775_v31, %v775_v31  ;;  %v852_v40 = vpack.c.bf16 %v776_v32, %v776_v32 }
 0x1da   : > { %v649_v22 = vrot.slane %v1674_v13, %v2365_v20  ;;  %v665_v23 = vrot.slane %v1676_v14, %v2365_v20  ;;  %v681_v24 = vrot.slane %v1678_v15, %v2365_v20  ;;  %v697_v25 = vrot.slane %v1680_v16, %v2365_v20 }
 0x1db   : > { %v863_v26 = vsel %vm858_vm2, %v849_v17, 0  ;;  %v909_v28 = vsel %vm858_vm2, %v850_v18, 0  ;;  %v955_v45 = vsel %vm858_vm2, %v851_v39, 0  ;;  %v1001_v46 = vsel %vm858_vm2, %v852_v40, 0 }
 0x1dc   : > { %1737 = vmatpush3.bf16.xpose.msra.mxu1 %v863_v26  ;;  %1743 = vmatpush3.bf16.xpose.msra.mxu0 %v909_v28  ;;  %v705_v29 = vcombine.low %v649_v22, %v665_v23  ;;  %v737_v30 = vcombine.low %v681_v24, %v697_v25  ;;  %v706_v34 = vcombine.high %v649_v22, %v665_v23 }
 0x1dd   : > { %1748 = vmatprep.subr.bf16.mxu1 %v2100_v0  ;;  %1754 = vmatprep.subr.bf16.mxu0 %v2100_v0  ;;  %v738_v35 = vcombine.high %v681_v24, %v697_v25 }
 0x1de   : > { %v713_v33 = vrot.slane %v705_v29, %v2367_v27  ;;  %v745_v36 = vrot.slane %v737_v30, %v2367_v27  ;;  %v720_v43 = vrot.slane %v706_v34, %v2367_v27 }
 0x1df   : > { %v752_v44 = vrot.slane %v738_v35, %v2367_v27 }
 0x1e0   : > { %v769_v37 = vcombine.low %v713_v33, %v745_v36  ;;  %v770_v38 = vcombine.high %v713_v33, %v745_v36 }
 0x1e1   : > { %v771_v47 = vcombine.low %v720_v43, %v752_v44  ;;  %v772_v48 = vcombine.high %v720_v43, %v752_v44 }
 0x1e2   : > { %v845_v41 = vpack.c.bf16 %v769_v37, %v769_v37  ;;  %v846_v42 = vpack.c.bf16 %v770_v38, %v770_v38 }
 0x1e3   : > { %v847_v49 = vpack.c.bf16 %v771_v47, %v771_v47  ;;  %v848_v50 = vpack.c.bf16 %v772_v48, %v772_v48 }
 0x1e4   : > { %1739 = vmatmul.mubr.msk.bf16.vlgmr.msra.gmra.mrb[0].mxu1 %vm858_vm2, %v845_v41  ;;  %1745 = vmatmul.mubr.msk.bf16.vlgmr.msra.gmra.mrb[4].mxu0 %vm858_vm2, %v846_v42 }
 0x1e5   : > { %1749 = vmatpush3.bf16.xpose.msra.mxu1 %v955_v45  ;;  %1755 = vmatpush3.bf16.xpose.msra.mxu0 %v1001_v46 }
 0x1e6   : > { %1750 = vmatprep.mubr.msk.bf16.mxu1 %vm2101_vm0, %v2100_v0  ;;  %1756 = vmatprep.mubr.msk.bf16.mxu0 %vm2101_vm0, %v2100_v0 }
 0x1e7   : > { %1760 = vmatprep.subr.bf16.mxu1 %v2100_v0  ;;  %1766 = vmatprep.subr.bf16.mxu0 %v2100_v0 }
 0x1ec   : > { %1751 = vmatmul.mubr.msk.bf16.vlgmr.msra.gmra.mrb[4].mxu1 %vm858_vm2, %v847_v49  ;;  %1757 = vmatmul.mubr.msk.bf16.vlgmr.msra.gmra.mrb[8].mxu0 %vm858_vm2, %v848_v50 }
 0x1ed   : > { %1762 = vmatprep.mubr.msk.bf16.mxu1 %vm2101_vm0, %v2100_v0  ;;  %1768 = vmatprep.mubr.msk.bf16.mxu0 %vm2101_vm0, %v2100_v0 }
 0x2b7   : > { %v899_v52 = vpop.f32.mrb[0].mxu1  ;;  %v945_v53 = vpop.f32.mrb[4].mxu0 }
 0x2b8   : > { %v900_v54 = vadd.f32 %v899_v52, %v857_v51  ;;  %v946_v55 = vadd.f32 %v945_v53, %v857_v51  ;;  %v1740_v56 = vpop.f32.mrb[1].mxu1  ;;  %v1746_v57 = vpop.f32.mrb[5].mxu0 }
 0x2b9   : > { %v902_v58 = vpop.f32.mrb[2].mxu1  ;;  %v948_v59 = vpop.f32.mrb[6].mxu0 }
 0x2ba   : > { %v1741_v60 = vpop.f32.mrb[3].mxu1  ;;  %v1747_v61 = vpop.f32.mrb[7].mxu0  ;;  %v1043_v62 = vsel %vm858_vm2, %v900_v54, -inf  ;;  %v1046_v63 = vsel %vm858_vm2, %v946_v55, -inf }
 0x2bb   : > { %1044 = vmax.xlane.f32.xlu1 %v1043_v62  ;;  %1047 = vmax.xlane.f32.xlu0 %v1046_v63 }
 0x2bf   : > { %v991_v1 = vpop.f32.mrb[4].mxu1  ;;  %v1037_v2 = vpop.f32.mrb[8].mxu0 }
 0x2c0   : > { %v992_v3 = vadd.f32 %v991_v1, %v857_v51  ;;  %v1038_v4 = vadd.f32 %v1037_v2, %v857_v51  ;;  %v1752_v5 = vpop.f32.mrb[5].mxu1  ;;  %v1758_v7 = vpop.f32.mrb[9].mxu0 }
 0x2c1   : > { %v994_v8 = vpop.f32.mrb[6].mxu1  ;;  %v1040_v9 = vpop.f32.mrb[10].mxu0 }
 0x2c2   : > { %v1753_v10 = vpop.f32.mrb[7].mxu1  ;;  %v1759_v11 = vpop.f32.mrb[11].mxu0  ;;  %v1049_v12 = vsel %vm858_vm2, %v992_v3, -inf  ;;  %v1052_v13 = vsel %vm858_vm2, %v1038_v4, -inf }
 0x2c3   : > { %1050 = vmax.xlane.f32.xlu0 %v1049_v12  ;;  %1053 = vmax.xlane.f32.xlu1 %v1052_v13 }
 0x2d4   : > { %428 = vrot.lane.b32.xlu1 %v2356_v6, %s2111_s23  ;;  %s2515_s23 = scalar_lea.hbm %s2604_s7, %s1705_s21 }
 0x2d9   : > { %425 = vrot.lane.b32.xlu0 %v2356_v6, %s2112_s29  ;;  %s1507_s29 = scalar_lea.sflag [#allocation10], %s2330_s12 }
 0x348   : > { %v1045_v14 = vpop.xlane.xlu1 %1044  ;;  %v1048_v15 = vpop.xlane.xlu0 %1047 }
 0x349   : > { %v1055_v16 = vsub.f32 %v900_v54, %v1045_v14  ;;  %v1056_v17 = vsub.f32 %v946_v55, %v1048_v15 }
 0x34b   : > { %v1059_v18 = vmul.f32 1.442695, %v1055_v16  ;;  %v1061_v19 = vmul.f32 1.442695, %v1056_v17 }
 0x34d   : > { %1889 = vpow2.f32 %v1059_v18 }
 0x34e   : > { %1891 = vpow2.f32 %v1061_v19 }
 0x350   : > { %v1054_v25 = vpop.xlane.xlu1 %1053  ;;  %v1051_v26 = vpop.xlane.xlu0 %1050 }
 0x351   : > { %v1058_v28 = vsub.f32 %v1038_v4, %v1054_v25  ;;  %v1057_v29 = vsub.f32 %v992_v3, %v1051_v26 }
 0x353   : > { %v1065_v30 = vmul.f32 1.442695, %v1058_v28  ;;  %v1063_v31 = vmul.f32 1.442695, %v1057_v29 }
 0x354   : > { %v429_v36 = vpop.permute.xlu1 %428 }
 0x355   : > { %1893 = vpow2.f32 %v1065_v30 }
 0x356   : > { %1895 = vpow2.f32 %v1063_v31 }
 0x357   : > { %v1890_v21 = vpop.eup %1889 }
 0x358   : > { %v1892_v22 = vpop.eup %1891  ;;  %v1067_v23 = vsel %vm858_vm2, %v1890_v21, 0.0 }
 0x359   : > { %1068 = vadd.xlane.f32.xlu0 %v1067_v23  ;;  %v1070_v24 = vsel %vm858_vm2, %v1892_v22, 0.0 }
 0x35a   : > { %1071 = vadd.xlane.f32.xlu1 %v1070_v24 }
 0x35f   : > { %v2436_v32 = vpop.eup %1893 }
 0x360   : > { %v2438_v33 = vpop.eup %1895  ;;  %v1076_v34 = vsel %vm858_vm2, %v2436_v32, 0.0 }
 0x361   : > { %v1073_v35 = vsel %vm858_vm2, %v2438_v33, 0.0 }
 0x36b   : > { %431 = vrot.lane.b32.xlu1 %v2356_v6, %s2113_s30  ;;  %s1991_s30 = scalar_lea.vmem %s2517_s15, 512 }
 0x36c   : > { %p1992_p8 = scmp.ne.s32.totalorder %s2517_s15, %s1991_s30 }
 0x36e   : > { %p1993_p1 = pnand %p1992_p8, %p2620_p0 }
 0x36f   : > { %434 = vrot.lane.b32.xlu0 %v2356_v6, %s2114_s9  ;;  %v426_v6 = vpop.permute.xlu0 %425  ;;  %s2118_s9 = smov [#allocation9]  }
 0x370   : > { %p1994_p3 = pneg %p1993_p1  ;;  %s1995_s20 = sshll.u32 %s2118_s9, 4  ;;  %s1996_s20 = int_to_ptr.vmem [resolvable:$false] %s1995_s20 }
 0x371   : > { %p1998_p7 = scmp.lt.s32.totalorder %s2517_s15, %s1996_s20 }
 0x38e   : > { %1077 = vadd.xlane.f32.xlu0 %v1076_v34 }
 0x38f   : > { %1074 = vadd.xlane.f32.xlu1 %v1073_v35 }
 0x3e6   : > { %v1069_v37 = vpop.xlane.xlu0 %1068 }
 0x3e7   : > { %1897 = vrcp.f32 %v1069_v37  ;;  %v1072_v38 = vpop.xlane.xlu1 %1071 }
 0x3e8   : > { %1899 = vrcp.f32 %v1072_v38 }
 0x3ea   : > { %v435_v39 = vpop.permute.xlu0 %434 }
 0x3eb   : > { %v589_v40 = vcombine.low %v429_v36, %v435_v39  ;;  %v590_v41 = vcombine.high %v429_v36, %v435_v39  ;;  %v432_v42 = vpop.permute.xlu1 %431 }
 0x3ec   : > { %v573_v43 = vcombine.low %v426_v6, %v432_v42  ;;  %v574_v44 = vcombine.high %v426_v6, %v432_v42 }
 0x3ed   : > { %v597_v45 = vrot.slane %v589_v40, %v2365_v20  ;;  %v604_v46 = vrot.slane %v590_v41, %v2365_v20 }
 0x3ee   : > { %v581_v47 = vrot.slane %v573_v43, %v2365_v20  ;;  %v588_v48 = vrot.slane %v574_v44, %v2365_v20 }
 0x3f0   : > { %v605_v49 = vcombine.low %v581_v47, %v597_v45  ;;  %v606_v50 = vcombine.high %v581_v47, %v597_v45  ;;  %v621_v51 = vcombine.low %v588_v48, %v604_v46  ;;  %v622_v52 = vcombine.high %v588_v48, %v604_v46 }
 0x3f1   : > { %v1898_v53 = vpop.eup %1897 }
 0x3f2   : > { %v1900_v54 = vpop.eup %1899  ;;  %v1080_v55 = vmul.f32 %v1898_v53, %v1890_v21  ;;  %v613_v56 = vrot.slane %v605_v49, %v2367_v27  ;;  %v620_v57 = vrot.slane %v606_v50, %v2367_v27  ;;  %v629_v58 = vrot.slane %v621_v51, %v2367_v27 }
 0x3f3   : > { %v1082_v59 = vmul.f32 %v1900_v54, %v1892_v22  ;;  %v636_v60 = vrot.slane %v622_v52, %v2367_v27 }
 0x3f4   : > { %1087 = vst.msk [vmem:[%s2453_s11] sm:$0xff] %vm858_vm2, %v1080_v55  ;;  %v777_v61 = vcombine.low %v613_v56, %v620_v57  ;;  %v1682_v62 = vcombine.high %v613_v56, %v620_v57  ;;  %v1091_v26 = vpack.c.bf16 %v1080_v55, %v1080_v55 }
 0x3f5   : > { %1088 = vst.msk [vmem:[%s2453_s11 + $0x8] sm:$0xff] %vm858_vm2, %v1082_v59  ;;  %v793_v63 = vcombine.low %v629_v58, %v636_v60  ;;  %v1683_v1 = vcombine.high %v629_v58, %v636_v60  ;;  %v1092_v28 = vpack.c.bf16 %v1082_v59, %v1082_v59 }
 0x3f6   : > { %v784_v2 = vrot.slane %v777_v61, %v2365_v20  ;;  %v792_v3 = vrot.slane %v1682_v62, %v2365_v20 }
 0x3f7   : > { %v800_v4 = vrot.slane %v793_v63, %v2365_v20  ;;  %v808_v5 = vrot.slane %v1683_v1, %v2365_v20 }
 0x3f8   : > { %v809_v7 = vcombine.low %v784_v2, %v792_v3  ;;  %v810_v8 = vcombine.high %v784_v2, %v792_v3  ;;  %v1887_v3 = vld [vmem:[#allocation7] sm:$0xff]  }
 0x3f9   : > { %v825_v9 = vcombine.low %v800_v4, %v808_v5  ;;  %v826_v10 = vcombine.high %v800_v4, %v808_v5 }
 0x3fa   : > { %v817_v11 = vrot.slane %v809_v7, %v2367_v27  ;;  %v824_v12 = vrot.slane %v810_v8, %v2367_v27 }
 0x3fb   : > { %v833_v13 = vrot.slane %v825_v9, %v2367_v27  ;;  %v840_v14 = vrot.slane %v826_v10, %v2367_v27 }
 0x3fd   : > { %v841_v15 = vcombine.low %v817_v11, %v833_v13  ;;  %v842_v16 = vcombine.high %v817_v11, %v833_v13  ;;  %v843_v17 = vcombine.low %v824_v12, %v840_v14  ;;  %v844_v18 = vcombine.high %v824_v12, %v840_v14  ;;  %v1888_v13 = vld [vmem:[#allocation7 + $0x8] sm:$0xff]  }
 0x3ff   : > { %v853_v19 = vpack.c.bf16 %v841_v15, %v841_v15  ;;  %v854_v21 = vpack.c.bf16 %v842_v16, %v842_v16  ;;  %v855_v24 = vpack.c.bf16 %v843_v17, %v843_v17  ;;  %v856_v25 = vpack.c.bf16 %v844_v18, %v844_v18 }
 0x401   : > { %v1100_v22 = vsel %vm1098_vm3, %v853_v19, 0  ;;  %v1146_v23 = vsel %vm1098_vm3, %v854_v21, 0  ;;  %v1192_v29 = vsel %vm1098_vm3, %v855_v24, 0  ;;  %v1238_v30 = vsel %vm1098_vm3, %v856_v25, 0 }
 0x402   : > { %1761 = vmatpush3.bf16.msra.mxu1 %v1100_v22  ;;  %1767 = vmatpush3.bf16.msra.mxu0 %v1146_v23 }
 0x403   : > { %1772 = vmatprep.subr.bf16.mxu1 %v2100_v0  ;;  %1778 = vmatprep.subr.bf16.mxu0 %v2100_v0 }
 0x405   : > { %1763 = vmatmul.mubr.msk.bf16.vlgmr.msra.gmra.mrb[8].mxu1 %vm858_vm2, %v1091_v26  ;;  %1769 = vmatmul.mubr.msk.bf16.vlgmr.msra.gmra.mrb[12].mxu0 %vm858_vm2, %v1092_v28 }
 0x406   : > { %1773 = vmatpush3.bf16.msra.mxu1 %v1192_v29  ;;  %1779 = vmatpush3.bf16.msra.mxu0 %v1238_v30 }
 0x407   : > { %1774 = vmatprep.mubr.msk.bf16.mxu1 %vm2101_vm0, %v2100_v0  ;;  %1780 = vmatprep.mubr.msk.bf16.mxu0 %vm2101_vm0, %v2100_v0 }
 0x408   : > { %1784 = vmatprep.subr.bf16.mxu1 %v2100_v0 }
 0x41b   : > { %v1078_v31 = vpop.xlane.xlu0 %1077 }
 0x41c   : > { %1901 = vrcp.f32 %v1078_v31  ;;  %v1075_v34 = vpop.xlane.xlu1 %1074 }
 0x41d   : > { %1903 = vrcp.f32 %v1075_v34 }
 0x426   : > { %v1902_v35 = vpop.eup %1901 }
 0x427   : > { %v1904_v6 = vpop.eup %1903  ;;  %v1086_v36 = vmul.f32 %v1902_v35, %v2436_v32 }
 0x428   : > { %v1084_v37 = vmul.f32 %v1904_v6, %v2438_v33 }
 0x429   : > { %1090 = vst.msk [vmem:[%s2453_s11 + $0x18] sm:$0xff] %vm858_vm2, %v1086_v36  ;;  %v1094_v38 = vpack.c.bf16 %v1086_v36, %v1086_v36 }
 0x42a   : > { %1089 = vst.msk [vmem:[%s2453_s11 + $0x10] sm:$0xff] %vm858_vm2, %v1084_v37  ;;  %v1093_v39 = vpack.c.bf16 %v1084_v37, %v1084_v37  ;;  %s1997_s11 = scalar_lea.vmem %s1996_s20, 1024 }
 0x42b   : > { %1781 = vmatmul.mubr.msk.bf16.vlgmr.msra.gmra.mrb[16].mxu0 %vm858_vm2, %v1094_v38  ;;  %p1999_p9 = scmp.lt.s32.totalorder %s1997_s11, %s1991_s30 }
 0x42c   : > { %1775 = vmatmul.mubr.msk.bf16.vlgmr.msra.gmra.mrb[12].mxu1 %vm858_vm2, %v1093_v39 }
 0x42d   : > { %1788 = vmatprep.mubr.msk.bf16.mxu1 %vm2101_vm0, %v2100_v0  ;;  %1785 = vmatpush3.bf16.msra.mxu1 %v1887_v3  ;;  %p2000_p12 = por %p1999_p9, %p1998_p7 }
 0x42e   : > { %1786 = vmatprep.subr.bf16.mxu1 %v2100_v0 }
 0x42f   : > { %p2001_p2 = pnand %p2000_p12, %p1994_p3 }
 0x431   : > { %1787 = vmatpush3.bf16.msra.mxu1 %v1888_v13 }
 0x4d8   : > { %v1136_v40 = vpop.f32.mrb[8].mxu1  ;;  %v1182_v41 = vpop.f32.mrb[12].mxu0 }
 0x4d9   : > { %v1764_v42 = vpop.f32.mrb[9].mxu1  ;;  %v1770_v43 = vpop.f32.mrb[13].mxu0 }
 0x4da   : > { %v1139_v32 = vpop.f32.mrb[10].mxu1  ;;  %v1185_v44 = vpop.f32.mrb[14].mxu0 }
 0x4db   : > { %v1765_v33 = vpop.f32.mrb[11].mxu1  ;;  %v1771_v45 = vpop.f32.mrb[15].mxu0 }
 0x4fe   : > { %v1274_v46 = vpop.f32.mrb[16].mxu0 }
 0x4ff   : > { %v1228_v47 = vpop.f32.mrb[12].mxu1  ;;  %v1296_v48 = vcombine.low %v1182_v41, %v1274_v46  ;;  %v1297_v49 = vcombine.high %v1182_v41, %v1274_v46  ;;  %v1782_v50 = vpop.f32.mrb[17].mxu0 }
 0x500   : > { %v1280_v51 = vcombine.low %v1136_v40, %v1228_v47  ;;  %v1281_v52 = vcombine.high %v1136_v40, %v1228_v47  ;;  %v1776_v53 = vpop.f32.mrb[13].mxu1  ;;  %v1277_v54 = vpop.f32.mrb[18].mxu0 }
 0x501   : > { %v1304_v55 = vrot.slane %v1296_v48, %v2365_v20  ;;  %v1311_v56 = vrot.slane %v1297_v49, %v2365_v20  ;;  %v1231_v57 = vpop.f32.mrb[14].mxu1  ;;  %v1783_v58 = vpop.f32.mrb[19].mxu0 }
 0x502   : > { %v1288_v59 = vrot.slane %v1280_v51, %v2365_v20  ;;  %v1295_v60 = vrot.slane %v1281_v52, %v2365_v20  ;;  %v1777_v61 = vpop.f32.mrb[15].mxu1 }
 0x504   : > { %v1312_v62 = vcombine.low %v1288_v59, %v1304_v55  ;;  %v1313_v63 = vcombine.high %v1288_v59, %v1304_v55  ;;  %v1328_v1 = vcombine.low %v1295_v60, %v1311_v56  ;;  %v1329_v2 = vcombine.high %v1295_v60, %v1311_v56 }
 0x506   : > { %v1320_v4 = vrot.slane %v1312_v62, %v2367_v27  ;;  %v1327_v5 = vrot.slane %v1313_v63, %v2367_v27  ;;  %v1336_v7 = vrot.slane %v1328_v1, %v2367_v27  ;;  %v1343_v8 = vrot.slane %v1329_v2, %v2367_v27 }
 0x508   : > { %v1348_v9 = vcombine.low %v1320_v4, %v1327_v5  ;;  %v1692_v10 = vcombine.high %v1320_v4, %v1327_v5  ;;  %v1364_v11 = vcombine.low %v1336_v7, %v1343_v8  ;;  %v1693_v12 = vcombine.high %v1336_v7, %v1343_v8 }
 0x50a   : > { %v1355_v14 = vrot.slane %v1348_v9, %v2365_v20  ;;  %v1363_v15 = vrot.slane %v1692_v10, %v2365_v20  ;;  %v1371_v16 = vrot.slane %v1364_v11, %v2365_v20  ;;  %v1379_v17 = vrot.slane %v1693_v12, %v2365_v20 }
 0x50c   : > { %v1381_v18 = vcombine.high %v1355_v14, %v1363_v15  ;;  %v1397_v19 = vcombine.high %v1371_v16, %v1379_v17  ;;  %v1380_v21 = vcombine.low %v1355_v14, %v1363_v15  ;;  %v1396_v22 = vcombine.low %v1371_v16, %v1379_v17 }
 0x50e   : > { %v1395_v0 = vrot.slane %v1381_v18, %v2367_v27  ;;  %v1411_v23 = vrot.slane %v1397_v19, %v2367_v27  ;;  %v1388_v24 = vrot.slane %v1380_v21, %v2367_v27  ;;  %v1404_v25 = vrot.slane %v1396_v22, %v2367_v27 }
 0x510   : > { %v1414_v26 = vcombine.low %v1395_v0, %v1411_v23  ;;  %v1413_v28 = vcombine.high %v1388_v24, %v1404_v25  ;;  %v1415_v29 = vcombine.high %v1395_v0, %v1411_v23  ;;  %v1412_v30 = vcombine.low %v1388_v24, %v1404_v25 }
 0x512   : > { %1421 = vrot.lane.b32.xlu1 %v1414_v26, %s2115_s22  ;;  %1417 = vrot.lane.b32.xlu0 %v1413_v28, %s2116_s10 }
 0x516   : > { %1425 = vrot.lane.b32.xlu1 %v1415_v29, %s2117_s18 }
 0x584   : > { %v1422_v20 = vpop.permute.xlu1 %1421  ;;  %v1418_v31 = vpop.permute.xlu0 %1417 }
 0x585   : > { %v1428_v34 = vsel %vm858_vm2, %v1412_v30, %v1418_v31 }
 0x586   : > { %v1430_v35 = vsel %vm1429_vm4, %v1428_v34, %v1422_v20 }
 0x588   : > { %v1426_v27 = vpop.permute.xlu1 %1425 }
 0x589   : > { %v1432_v6 = vsel %vm1431_vm5, %v1430_v35, %v1426_v27 }
 0x58a   : > { %v1433_v36 = vpack.c.bf16 %v1432_v6, %v1432_v6 }
 0x58c   : > { %1789 = vmatmul.mubr.msk.bf16.vlgmr.msra.gmra.mrb[16].mxu1 %vm359_vm1, %v1433_v36 }
 0x58d   : > { %2004 = shalt.err (!%p2001_p2)
}
 0x58e   : > { %s2005_s22 = scalar_lea.hbm %s2515_s23, 512  ;;  %s2009_s19 = scalar_lea.hbm %s2604_s7, 1024 }
 0x58f   : > { %p2006_p13 = scmp.ne.s32.totalorder %s2515_s23, %s2005_s22  ;;  %p2010_p4 = scmp.lt.u32.totalorder %s2515_s23, %s2604_s7 }
 0x590   : > { %p2011_p5 = scmp.lt.u32.totalorder %s2009_s19, %s2005_s22  ;;  %p2013_p8 = scmp.lt.u32.totalorder %s2005_s22, %s2515_s23 }
 0x591   : > { %p2007_p6 = pnand %p2006_p13, %p2620_p0 }
 0x592   : > { %p2012_p11 = por %p2011_p5, %p2010_p4 }
 0x593   : > { %p2008_p10 = pneg %p2007_p6 }
 0x594   : > { %p2014_p1 = por %p2013_p8, %p2012_p11 }
 0x596   : > { %p2015_p3 = pnand %p2014_p1, %p2008_p10 }
 0x598   : > { %2018 = shalt.err (!%p2015_p3)
}
 0x599   : > { %s2119_s30 = smov 128   ;;  %s1668_s20 = sshll.u32 %s2330_s12, 3  ;;  %v1694_v37 = vld [vmem:[%s2601_s4] ss:$0 sm:$0xff] }
 0x59a   : > { %1803 = dma.vmem_to_hbm [thread:$0]  (%p2620_p0), %s2517_s15, 512, %s2515_s23, %s1507_s29, %s2119_s30, %s2119_s30, %s2116_s10  }
 0x59b   : > { %s1700_s22 = sshll.u32 %s2182_s28, 7  ;;  %s326_s21 = scalar_lea.vmem [#allocation8], %s1668_s20 }
 0x59c   : > { %s1520_s19 = sshll.u32 %s326_s21, 4  ;;  %s2552_s0 = scalar_lea.hbm %s2603_s6, %s1700_s22  ;;  %s2554_s19 = int_to_ptr.vmem [resolvable:$true] %s1520_s19 }
 0x59d   : > { %s1502_s28 = scalar_lea.sflag [#allocation4], %s2330_s12  ;;  %s2019_s10 = scalar_lea.vmem %s2554_s19, 128 }
 0x59e   : > { %p2020_p7 = scmp.ne.s32.totalorder %s2554_s19, %s2019_s10  ;;  %s2120_s15 = smov [#allocation8]  }
 0x59f   : > { %s2023_s23 = sshll.u32 %s2120_s15, 4  ;;  %s2024_s23 = int_to_ptr.vmem [resolvable:$false] %s2023_s23 }
 0x5a0   : > { %p2021_p9 = pnand %p2020_p7, %p2620_p0  ;;  %s2025_s29 = scalar_lea.vmem %s2024_s23, 256 }
 0x5a1   : > { %p2026_p2 = scmp.lt.s32.totalorder %s2554_s19, %s2024_s23  ;;  %p2027_p13 = scmp.lt.s32.totalorder %s2025_s29, %s2019_s10 }
 0x5a2   : > { %p2022_p12 = pneg %p2021_p9 }
 0x5a3   : > { %p2028_p6 = por %p2027_p13, %p2026_p2 }
 0x5a5   : > { %p2029_p10 = pnand %p2028_p6, %p2022_p12 }
 0x65f   : > { %v1494_v38 = vpop.f32.mrb[16].mxu1 }
 0x660   : > { %v1495_v39 = vadd.f32 %v1694_v37, %v1494_v38  ;;  %v1790_v40 = vpop.f32.mrb[17].mxu1 }
 0x661   : > { %v1497_v41 = vpop.f32.mrb[18].mxu1 }
 0x662   : > { %v1791_v42 = vpop.f32.mrb[19].mxu1  ;;  %1500 = vst.msk [vmem:[%s326_s21] sm:$0xff] %vm359_vm1, %v1495_v39 }
 0x663   : > { %2032 = shalt.err (!%p2029_p10)
}
 0x664   : > { %s2033_s12 = scalar_lea.hbm %s2552_s0, 128  ;;  %s2037_s11 = scalar_lea.hbm %s2603_s6, 256 }
 0x665   : > { %p2034_p4 = scmp.ne.s32.totalorder %s2552_s0, %s2033_s12  ;;  %p2038_p8 = scmp.lt.u32.totalorder %s2552_s0, %s2603_s6 }
 0x666   : > { %p2039_p1 = scmp.lt.u32.totalorder %s2037_s11, %s2033_s12  ;;  %p2041_p7 = scmp.lt.u32.totalorder %s2033_s12, %s2552_s0 }
 0x667   : > { %p2035_p5 = pnand %p2034_p4, %p2620_p0 }
 0x668   : > { %p2040_p3 = por %p2039_p1, %p2038_p8 }
 0x669   : > { %p2036_p11 = pneg %p2035_p5 }
 0x66a   : > { %p2042_p9 = por %p2041_p7, %p2040_p3 }
 0x66c   : > { %p2043_p12 = pnand %p2042_p9, %p2036_p11 }
 0x66e   : > { %2046 = shalt.err (!%p2043_p12)
}
 0x66f   : > { %1802 = dma.vmem_to_hbm [thread:$0]  (%p2620_p0), %s2554_s19, 128, %s2552_s0, %s1502_s28  }
 0x670 PF: > { %s1548_s21 = sand.u32 1, %s2081_s24   ;;  %p2621_p2 = scmp.ne.s32.totalorder %s2610_s8, 0 }
 0x671   : > { %p2622_p13 = scmp.ge.s32.totalorder %s2093_s27, 2  ;;  %s1549_s14 = scalar_lea.sflag [#allocation4], %s1548_s21 }
 0x673   : > { %p1818_p6 = pnand %p2622_p13, %p2621_p2 }
 0x675   : > { %2072 = dma.done.wait (!%p1818_p6), %s1549_s14, 128  }
 0x676   : > { %2074 = vsyncadd (!%p1818_p6), %s1549_s14, 4294967168  ;;  %s1558_s9 = scalar_lea.sflag [#allocation10], %s1548_s21 }
 0x677   : > { %2076 = dma.done.wait (!%p1818_p6), %s1558_s9, 512  }
 0x678   : > { %2078 = vsyncadd (!%p1818_p6), %s1558_s9, 4294966784  ;;  %p25_p0 = scmp.ge.s32.totalorder %s2271_s13, 4   ;;  %s2623_s24 = smov %s2085_s25 }
 0x679   : > { %s2624_s25 = smov %s2089_s26  ;;  %s2625_s26 = smov %s2287_s17 }
 0x67a   : > { %s2626_s27 = smov %s2271_s13  ;;  %27 = sbr.rel (!%p25_p0) target bundleno = 10 (0xa), region = 114 }
 0x681   :  { %1563 = vsyncpa [#allocation3], 1 }
 0x682   :  { %1565 = vsyncpa [#allocation3 + $0x1], 1 }
 0x683   :  { %1566 = vsyncpa [#allocation6], 1 }
 0x684   :  { %1567 = vsyncpa [#allocation4], 1 }
 0x685   :  { %1569 = vsyncpa [#allocation4 + $0x1], 1 }
 0x686   :  { %1570 = vsyncpa [#allocation10], 1 }
 0x687   :  { %1572 = vsyncpa [#allocation10 + $0x1], 1 }

</bundles_post_ra>
